<compile_context>
chip_gen: v5e
topology: v5e:2x2
jax: 0.10.0
libtpu: 0.0.40
codegen_flags: <defaults>
</compile_context>

<pallas_src>
import jax
import jax.numpy as jnp
from jax.experimental import pallas as pl
from jax.experimental.pallas import tpu as pltpu

NUM_TASKS = 4
LN_EPS = 1e-5
_SQRT2 = 1.4142135623730951


# ----------------------------------------------------------------------------
# Math helpers
# ----------------------------------------------------------------------------
def _erf(x, recip):
    # Abramowitz & Stegun 7.1.26 rational approximation (|err| < 1.5e-7).
    a1, a2, a3, a4, a5 = 0.254829592, -0.284496736, 1.421413741, -1.453152027, 1.061405429
    p = 0.3275911
    sign = jnp.where(x >= 0.0, 1.0, -1.0)
    ax = jnp.abs(x)
    t = recip(1.0 + p * ax)
    poly = ((((a5 * t + a4) * t + a3) * t + a2) * t + a1) * t
    return sign * (1.0 - poly * jnp.exp(-ax * ax))


def _gelu(x, recip=lambda v: 1.0 / v):
    # Exact (erf-based) GELU, matching torch.nn.GELU() default.
    return 0.5 * x * (1.0 + _erf(x / _SQRT2, recip))


def _fast_recip(x):
    # EUP approx reciprocal + 2 Newton-Raphson steps -> ~f32 accurate; keeps the
    # divide off the VALU (the EUP slot is otherwise mostly idle here).
    y = pl.reciprocal(x, approx=True)
    y = y * (2.0 - x * y)
    y = y * (2.0 - x * y)
    return y


def _layer_norm(x, gamma, beta):
    mu = jnp.mean(x, axis=-1, keepdims=True)
    var = jnp.mean((x - mu) ** 2, axis=-1, keepdims=True)
    return (x - mu) * jax.lax.rsqrt(var + LN_EPS) * gamma + beta


# ----------------------------------------------------------------------------
# Kernel A: fully-resident weights, grid over token tiles only.
# ----------------------------------------------------------------------------
def _adapter_resident_kernel(x_ref, tw_ref,
                             wd_ref, bd_ref,      # [H, 4*Hq], [1, 4*Hq]  (merged down-proj)
                             wu_ref, bu_ref,      # [4, Hq, H], [4, 1, H]
                             lng_ref, lnb_ref,    # [4, 1, H] x2
                             fw_ref, fb_ref,      # [4, H, H], [1, H]     (fusion split per task)
                             fg_ref, fbeta_ref,   # [1, H] x2
                             out_ref):            # [TM, H]
    x = x_ref[...].astype(jnp.float32)
    tm, hidden = x.shape
    bottleneck = wu_ref.shape[1]

    def mm(a, w):
        # Cast activation to the weight dtype (f32 or bf16) for the MXU; f32 accumulate.
        return jnp.dot(a.astype(w.dtype), w, preferred_element_type=jnp.float32)

    # All 4 down-projections in one full-width MXU matmul.
    h = _gelu(mm(x, wd_ref[...]) + bd_ref[...], _fast_recip)      # [TM, 4*Hq]

    acc = jnp.zeros((tm, hidden), jnp.float32)
    for i in range(NUM_TASKS):
        hi = h[:, i * bottleneck:(i + 1) * bottleneck]            # static lane slice
        a = mm(hi, wu_ref[i]) + bu_ref[i]                         # up-projection [TM, H]
        adapted = _layer_norm(x + a, lng_ref[i], lnb_ref[i])      # per-adapter residual+LN
        weighted = adapted * tw_ref[:, i:i + 1]                   # per-token task weight
        acc = acc + mm(weighted, fw_ref[i])                       # fusion block i

    fused = x + acc + fb_ref[...]
    out_ref[...] = _layer_norm(fused, fg_ref[...], fbeta_ref[...]).astype(out_ref.dtype)


# ----------------------------------------------------------------------------
# Kernel B: task-split variant for large H (v7x): grid = (token_tiles, NUM_TASKS),
# task axis inner/"arbitrary", per-task weights streamed, accumulator in scratch.
# ----------------------------------------------------------------------------
def _adapter_task_split_kernel(x_ref, tw_ref,
                               wd_ref, bd_ref,     # [1, H, Hq], [1, 1, Hq]   (task i slice)
                               wu_ref, bu_ref,     # [1, Hq, H], [1, 1, H]
                               lng_ref, lnb_ref,   # [1, 1, H] x2
                               fw_ref,             # [1, H, H]
                               fb_ref, fg_ref, fbeta_ref,   # [1, H] x3 (resident)
                               out_ref,            # [TM, H]
                               acc_ref):           # VMEM scratch [TM, H] f32
    i = pl.program_id(1)
    x = x_ref[...].astype(jnp.float32)

    @pl.when(i == 0)
    def _():
        acc_ref[...] = jnp.zeros_like(acc_ref)

    def mm(a, w):
        return jnp.dot(a.astype(w.dtype), w, preferred_element_type=jnp.float32)

    h = _gelu(mm(x, wd_ref[0]) + bd_ref[0], _fast_recip)          # [TM, Hq]
    a = mm(h, wu_ref[0]) + bu_ref[0]                              # [TM, H]
    adapted = _layer_norm(x + a, lng_ref[0], lnb_ref[0])

    # Dynamic task-weight column select without a dynamic lane slice.
    col = jax.lax.broadcasted_iota(jnp.int32, (1, NUM_TASKS), 1)
    w_i = jnp.sum(tw_ref[...] * (col == i).astype(jnp.float32),
                  axis=-1, keepdims=True)                         # [TM, 1]

    acc_ref[...] += mm(adapted * w_i, fw_ref[0])

    @pl.when(i == NUM_TASKS - 1)
    def _():
        fused = x + acc_ref[...] + fb_ref[...]
        out_ref[...] = _layer_norm(fused, fg_ref[...], fbeta_ref[...]).astype(out_ref.dtype)


# ----------------------------------------------------------------------------
# Wrapper
# ----------------------------------------------------------------------------
def _round_up(n, m):
    return (n + m - 1) // m * m


def _vmem_capacity_bytes():
    try:
        info = pltpu.get_tpu_info()
        cap = int(getattr(info, "vmem_capacity_bytes", 0) or 0)
        if cap > 0:
            return cap
    except Exception:
        pass
    return 128 << 20    # v5e/v6e physical; v7x reports 64 MiB per TensorCore


def _nbytes(*arrays):
    return sum(int(a.size) * a.dtype.itemsize for a in arrays)


def _resident_spec(a):
    """Whole-array, constant-index BlockSpec, single-buffered (fetched once)."""
    nd = a.ndim
    idx = lambda *_: (0,) * nd
    try:
        return pl.BlockSpec(a.shape, idx, pipeline_mode=pl.Buffered(1))
    except Exception:   # older API without pipeline_mode / Buffered: default buffering
        return pl.BlockSpec(a.shape, idx)


def multi_task_adapter(x, params, *, task_weights=None, tm=None,
                       matmul_dtype=jnp.float32, force_task_split=None):
    B, S, H = x.shape
    Hq = H // NUM_TASKS
    N = B * S

    vmem_cap = _vmem_capacity_bytes()
    vmem_budget = int(vmem_cap * 0.82)          # headroom for Mosaic internal scratch
    if tm is None:
        # 128-MiB parts (v5e/v6e): longer MXU runs; 64-MiB/TC (v7x): keep temporaries small.
        tm = 512 if vmem_cap >= (100 << 20) else 256

    # ------------- router: plain XLA (three tiny matmuls on [B, H]) ---------
    if task_weights is None:
        pooled = jnp.mean(x.astype(jnp.float32), axis=1)
        h = _gelu(pooled @ params["rw1"] + params["rb1"])
        h = _gelu(h @ params["rw2"] + params["rb2"])
        logit = jax.nn.sigmoid(
            jnp.sum(h * params["rw3t"], axis=-1, keepdims=True) + params["rb3"])
        tw = jax.nn.softmax(jnp.broadcast_to(logit, (B, NUM_TASKS)), axis=-1)
    else:
        tw = task_weights.astype(jnp.float32)

    # ------------- token-major activations + per-token task weights ---------
    x2 = x.reshape(N, H)
    tw_tok = jnp.repeat(tw, S, axis=0)                          # [N, NUM_TASKS]

    # >= 2 grid steps when possible so both v7x TensorCores get work (megacore).
    if N <= tm:
        tm_eff = max(8, _round_up((N + 1) // 2, 8))
    else:
        tm_eff = _round_up(tm, 8)
    n_pad = _round_up(N, tm_eff)
    if n_pad != N:
        x2 = jnp.pad(x2, ((0, n_pad - N), (0, 0)))
        tw_tok = jnp.pad(tw_tok, ((0, n_pad - N), (0, 0)))
    n_tiles = n_pad // tm_eff

    wdt = matmul_dtype
    wsize = jnp.dtype(wdt).itemsize
    io_bytes = 2 * (2 * tm_eff * H * 4 + tm_eff * NUM_TASKS * 4)   # dbl-buffered x/out/tw tiles

    # VMEM accounting (analytic) for mode selection.
    resident_w_bytes = (2 * H * H * wsize                 # merged wd + wu
                        + NUM_TASKS * H * H * wsize        # fw
                        + H * 4                            # bd
                        + 3 * NUM_TASKS * H * 4            # bu, lng, lnb
                        + 3 * H * 4)                       # fb, fg, fbeta
    resident_need = (resident_w_bytes + io_bytes
                     + 6 * tm_eff * H * 4                  # live [TM,H] f32 temporaries
                     + (2 << 20))                          # compiler scratch headroom
    use_task_split = (resident_need > vmem_budget
                      if force_task_split is None else bool(force_task_split))

    out_shape = jax.ShapeDtypeStruct((n_pad, H), x.dtype)
    flops = int(12 * n_pad * H * H)
    transc = int(2 * n_pad * H)

    if not use_task_split:
        # -------- fully-resident weights, grid over token tiles only --------
        wd_all = jnp.transpose(params["wd"], (1, 0, 2)).reshape(H, NUM_TASKS * Hq).astype(wdt)
        bd_all = params["bd"].reshape(1, NUM_TASKS * Hq)
        wu_c = params["wu"].astype(wdt)
        fw_r = params["fw"].reshape(NUM_TASKS, H, H).astype(wdt)
        resident_args = (wd_all, bd_all, wu_c, params["bu"], params["lng"], params["lnb"],
                         fw_r, params["fb"], params["fg"], params["fbeta"])

        tok_spec = pl.BlockSpec((tm_eff, H), lambda t: (t, 0))
        tw_spec = pl.BlockSpec((tm_eff, NUM_TASKS), lambda t: (t, 0))
        w_specs = [_resident_spec(a) for a in resident_args]

        cost = pl.CostEstimate(
            flops=flops, transcendentals=transc,
            bytes_accessed=int(2 * n_pad * H * 4 + n_pad * NUM_TASKS * 4
                               + _nbytes(*resident_args)))
        out_pad = pl.pallas_call(
            _adapter_resident_kernel,
            out_shape=out_shape,
            grid=(n_tiles,),
            in_specs=[tok_spec, tw_spec] + w_specs,
            out_specs=tok_spec,
            compiler_params=pltpu.CompilerParams(
                dimension_semantics=("parallel",),
                vmem_limit_bytes=int(min(max(resident_need, 32 << 20), vmem_budget))),
            cost_estimate=cost,
        )(x2, tw_tok, *resident_args)
    else:
        # -------- task-split: per-task weight blocks streamed ---------------
        # TODO(synk): if even a single task's fw (H*H) tile exceeds the VMEM budget,
        # a further split over the fusion output columns would be needed.
        wd_s = params["wd"].astype(wdt)                     # [4, H, Hq]
        wu_s = params["wu"].astype(wdt)                     # [4, Hq, H]
        fw_r = params["fw"].reshape(NUM_TASKS, H, H).astype(wdt)
        task_args = (wd_s, params["bd"], wu_s, params["bu"],
                     params["lng"], params["lnb"], fw_r)
        small_args = (params["fb"], params["fg"], params["fbeta"])

        tok_spec = pl.BlockSpec((tm_eff, H), lambda t, i: (t, 0))
        tw_spec = pl.BlockSpec((tm_eff, NUM_TASKS), lambda t, i: (t, 0))

        def _per_task(a):
            nd = a.ndim
            return pl.BlockSpec((1,) + tuple(a.shape[1:]),
                                lambda t, i, _nd=nd: (i,) + (0,) * (_nd - 1))

        per_task_bytes = sum((int(a.size) // NUM_TASKS) * a.dtype.itemsize for a in task_args)
        need = (2 * per_task_bytes + _nbytes(*small_args) + io_bytes
                + tm_eff * H * 4                           # acc scratch
                + 5 * tm_eff * H * 4 + (2 << 20))          # temporaries + headroom
        cost = pl.CostEstimate(
            flops=flops, transcendentals=transc,
            bytes_accessed=int(2 * n_pad * H * 4 + n_pad * NUM_TASKS * 4
                               + n_tiles * NUM_TASKS * per_task_bytes))
        out_pad = pl.pallas_call(
            _adapter_task_split_kernel,
            out_shape=out_shape,
            grid=(n_tiles, NUM_TASKS),
            in_specs=([tok_spec, tw_spec] + [_per_task(a) for a in task_args]
                      + [_resident_spec(a) for a in small_args]),
            out_specs=tok_spec,
            scratch_shapes=[pltpu.VMEM((tm_eff, H), jnp.float32)],
            compiler_params=pltpu.CompilerParams(
                dimension_semantics=("parallel", "arbitrary"),
                vmem_limit_bytes=int(min(max(need, 32 << 20), vmem_budget))),
            cost_estimate=cost,
        )(x2, tw_tok, *task_args, *small_args)

    return out_pad[:N].reshape(B, S, H)


# ----------------------------------------------------------------------------
# Parameter init (matches the PyTorch module's shapes; Linear stored [in, out])
# ----------------------------------------------------------------------------
def init_params(key, hidden_size):
    H = hidden_size
    Hh = H // 2
    Hq = H // 4
    ks = iter(jax.random.split(key, 32))

    def lin(k, fan_in, shape):
        bound = 1.0 / jnp.sqrt(float(fan_in))
        return jax.random.uniform(k, shape, jnp.float32, -bound, bound)

    return {
        # router MLP
        "rw1": lin(next(ks), H, (H, Hh)),
        "rb1": lin(next(ks), H, (1, Hh)),
        "rw2": lin(next(ks), Hh, (Hh, Hq)),
        "rb2": lin(next(ks), Hh, (1, Hq)),
        "rw3t": lin(next(ks), Hq, (1, Hq)),     # Linear(H/4 -> 1), stored transposed
        "rb3": lin(next(ks), Hq, (1, 1)),
        # 4 task adapters ('generation' fallback of each TaskAdapter), stacked
        "wd": lin(next(ks), H, (NUM_TASKS, H, Hq)),
        "bd": lin(next(ks), H, (NUM_TASKS, 1, Hq)),
        "wu": lin(next(ks), Hq, (NUM_TASKS, Hq, H)),
        "bu": lin(next(ks), Hq, (NUM_TASKS, 1, H)),
        "lng": jnp.ones((NUM_TASKS, 1, H), jnp.float32),
        "lnb": jnp.zeros((NUM_TASKS, 1, H), jnp.float32),
        # fusion linear + final LayerNorm
        "fw": lin(next(ks), NUM_TASKS * H, (NUM_TASKS * H, H)),
        "fb": lin(next(ks), NUM_TASKS * H, (1, H)),
        "fg": jnp.ones((1, H), jnp.float32),
        "fbeta": jnp.zeros((1, H), jnp.float32),
    }


def reference_jax(x, p):
    """Pure-JAX reference (same math as the PyTorch forward in eval mode)."""
    B, S, H = x.shape
    hp = jax.lax.Precision.HIGHEST
    pooled = jnp.mean(x, axis=1)
    h = _gelu(jnp.dot(pooled, p["rw1"], precision=hp) + p["rb1"])
    h = _gelu(jnp.dot(h, p["rw2"], precision=hp) + p["rb2"])
    logit = jax.nn.sigmoid(jnp.sum(h * p["rw3t"], -1, keepdims=True) + p["rb3"])
    tw = jax.nn.softmax(jnp.broadcast_to(logit, (B, NUM_TASKS)), axis=-1)
    x2 = x.reshape(B * S, H)
    outs = []
    for i in range(NUM_TASKS):
        a = jnp.dot(_gelu(jnp.dot(x2, p["wd"][i], precision=hp) + p["bd"][i]),
                    p["wu"][i], precision=hp) + p["bu"][i]
        a = _layer_norm(x2 + a, p["lng"][i], p["lnb"][i]).reshape(B, S, H)
        outs.append(a * tw[:, i].reshape(B, 1, 1))
    combined = jnp.concatenate(outs, axis=-1).reshape(B * S, NUM_TASKS * H)
    fused = (jnp.dot(combined, p["fw"], precision=hp) + p["fb"]).reshape(B, S, H)
    return _layer_norm(x + fused, p["fg"], p["fbeta"])


if __name__ == "__main__":
    B, S, H = 2, 8, 32  # hidden_size=32 -> bottleneck 8, router hidden 16/8
    key = jax.random.PRNGKey(0)
    kx, kp = jax.random.split(key)
    x = jax.random.normal(kx, (B, S, H), jnp.float32)
    params = init_params(kp, H)

    ref = reference_jax(x, params)

    # f32, fully-resident-weights path.
    out = jax.block_until_ready(multi_task_adapter(x, params))
    assert out.shape == (B, S, H)
    assert jnp.allclose(out, ref, atol=1e-3, rtol=1e-3), \
        float(jnp.max(jnp.abs(out - ref)))

    # f32, task-split (streamed per-task weights) path -- the large-H / v7x variant.
    out_ts = jax.block_until_ready(
        multi_task_adapter(x, params, force_task_split=True))
    assert jnp.allclose(out_ts, ref, atol=1e-3, rtol=1e-3), \
        float(jnp.max(jnp.abs(out_ts - ref)))

    # bf16 MXU path (all generations incl. v5e): loose sanity check only.
    out_bf16 = jax.block_until_ready(
        multi_task_adapter(x, params, matmul_dtype=jnp.bfloat16))
    assert out_bf16.shape == (B, S, H)
    assert bool(jnp.all(jnp.isfinite(out_bf16)))
    assert float(jnp.max(jnp.abs(out_bf16 - ref))) < 0.1

    print("KERNEL_OK")
</pallas_src>

<mosaic_0001>
module attributes {stable_mosaic.version = 11 : i64} {
  func.func @_adapter_resident_kernel(%arg0: i32, %arg1: memref<8x32xf32, #tpu.memory_space<vmem>>, %arg2: memref<8x4xf32, #tpu.memory_space<vmem>>, %arg3: memref<32x32xf32, #tpu.memory_space<vmem>>, %arg4: memref<1x32xf32, #tpu.memory_space<vmem>>, %arg5: memref<4x8x32xf32, #tpu.memory_space<vmem>>, %arg6: memref<4x1x32xf32, #tpu.memory_space<vmem>>, %arg7: memref<4x1x32xf32, #tpu.memory_space<vmem>>, %arg8: memref<4x1x32xf32, #tpu.memory_space<vmem>>, %arg9: memref<4x32x32xf32, #tpu.memory_space<vmem>>, %arg10: memref<1x32xf32, #tpu.memory_space<vmem>>, %arg11: memref<1x32xf32, #tpu.memory_space<vmem>>, %arg12: memref<1x32xf32, #tpu.memory_space<vmem>>, %arg13: memref<8x32xf32, #tpu.memory_space<vmem>>) attributes {dimension_semantics = [#tpu.dimension_semantics<parallel>], iteration_bounds = array<i64: 2>, scalar_prefetch = 0 : i64, scratch_operands = 0 : i64, tpu.core_type = #tpu.core_type<tc>, window_params = [{transform_indices = @transform_0, window_bounds = array<i64: 8, 32>}, {transform_indices = @transform_1, window_bounds = array<i64: 8, 4>}, {pipeline_mode = #tpu.pipeline_mode<synchronous>, transform_indices = @transform_2, window_bounds = array<i64: 32, 32>}, {pipeline_mode = #tpu.pipeline_mode<synchronous>, transform_indices = @transform_3, window_bounds = array<i64: 1, 32>}, {pipeline_mode = #tpu.pipeline_mode<synchronous>, transform_indices = @transform_4, window_bounds = array<i64: 4, 8, 32>}, {pipeline_mode = #tpu.pipeline_mode<synchronous>, transform_indices = @transform_5, window_bounds = array<i64: 4, 1, 32>}, {pipeline_mode = #tpu.pipeline_mode<synchronous>, transform_indices = @transform_6, window_bounds = array<i64: 4, 1, 32>}, {pipeline_mode = #tpu.pipeline_mode<synchronous>, transform_indices = @transform_7, window_bounds = array<i64: 4, 1, 32>}, {pipeline_mode = #tpu.pipeline_mode<synchronous>, transform_indices = @transform_8, window_bounds = array<i64: 4, 32, 32>}, {pipeline_mode = #tpu.pipeline_mode<synchronous>, transform_indices = @transform_9, window_bounds = array<i64: 1, 32>}, {pipeline_mode = #tpu.pipeline_mode<synchronous>, transform_indices = @transform_10, window_bounds = array<i64: 1, 32>}, {pipeline_mode = #tpu.pipeline_mode<synchronous>, transform_indices = @transform_11, window_bounds = array<i64: 1, 32>}, {transform_indices = @transform_12, window_bounds = array<i64: 8, 32>}]} {
    %c0 = arith.constant 0 : index
    %c0_0 = arith.constant 0 : index
    %0 = vector.load %arg1[%c0, %c0_0] : memref<8x32xf32, #tpu.memory_space<vmem>>, vector<8x32xf32>
    %c0_1 = arith.constant 0 : index
    %c0_2 = arith.constant 0 : index
    %1 = vector.load %arg3[%c0_1, %c0_2] : memref<32x32xf32, #tpu.memory_space<vmem>>, vector<32x32xf32>
    %cst = arith.constant dense<0.000000e+00> : vector<8x32xf32>
    %2 = tpu.matmul %0, %1, %cst {dimension_numbers = #tpu.dot_dimension_numbers<[1], [0], [0], [1], [0, 0, 1, 1], [], []>} : vector<8x32xf32>, vector<32x32xf32>, vector<8x32xf32> -> vector<8x32xf32>
    %c0_3 = arith.constant 0 : index
    %c0_4 = arith.constant 0 : index
    %3 = vector.load %arg4[%c0_3, %c0_4] : memref<1x32xf32, #tpu.memory_space<vmem>>, vector<1x32xf32>
    %4 = vector.broadcast %3 : vector<1x32xf32> to vector<8x32xf32>
    %5 = arith.addf %2, %4 : vector<8x32xf32>
    %cst_5 = arith.constant 5.000000e-01 : f32
    %6 = vector.broadcast %cst_5 : f32 to vector<8x32xf32>
    %7 = arith.mulf %6, %5 : vector<8x32xf32>
    %cst_6 = arith.constant 1.41421354 : f32
    %8 = vector.broadcast %cst_6 : f32 to vector<8x32xf32>
    %9 = arith.divf %5, %8 : vector<8x32xf32>
    %cst_7 = arith.constant 0.000000e+00 : f32
    %10 = vector.broadcast %cst_7 : f32 to vector<8x32xf32>
    %11 = arith.cmpf oge, %9, %10 : vector<8x32xf32>
    %cst_8 = arith.constant 1.000000e+00 : f32
    %cst_9 = arith.constant -1.000000e+00 : f32
    %12 = vector.broadcast %cst_8 : f32 to vector<8x32xf32>
    %13 = vector.broadcast %cst_9 : f32 to vector<8x32xf32>
    %14 = arith.select %11, %12, %13 : vector<8x32xi1>, vector<8x32xf32>
    %15 = math.absf %9 : vector<8x32xf32>
    %cst_10 = arith.constant 0.327591091 : f32
    %16 = vector.broadcast %cst_10 : f32 to vector<8x32xf32>
    %17 = arith.mulf %16, %15 : vector<8x32xf32>
    %cst_11 = arith.constant 1.000000e+00 : f32
    %18 = vector.broadcast %cst_11 : f32 to vector<8x32xf32>
    %19 = arith.addf %18, %17 : vector<8x32xf32>
    %20 = tpu.reciprocal %19 {approx = true} : vector<8x32xf32> -> vector<8x32xf32>
    %21 = arith.mulf %19, %20 : vector<8x32xf32>
    %cst_12 = arith.constant 2.000000e+00 : f32
    %22 = vector.broadcast %cst_12 : f32 to vector<8x32xf32>
    %23 = arith.subf %22, %21 : vector<8x32xf32>
    %24 = arith.mulf %20, %23 : vector<8x32xf32>
    %25 = arith.mulf %19, %24 : vector<8x32xf32>
    %cst_13 = arith.constant 2.000000e+00 : f32
    %26 = vector.broadcast %cst_13 : f32 to vector<8x32xf32>
    %27 = arith.subf %26, %25 : vector<8x32xf32>
    %28 = arith.mulf %24, %27 : vector<8x32xf32>
    %cst_14 = arith.constant 1.06140542 : f32
    %29 = vector.broadcast %cst_14 : f32 to vector<8x32xf32>
    %30 = arith.mulf %29, %28 : vector<8x32xf32>
    %cst_15 = arith.constant -1.45315206 : f32
    %31 = vector.broadcast %cst_15 : f32 to vector<8x32xf32>
    %32 = arith.addf %30, %31 : vector<8x32xf32>
    %33 = arith.mulf %32, %28 : vector<8x32xf32>
    %cst_16 = arith.constant 1.42141378 : f32
    %34 = vector.broadcast %cst_16 : f32 to vector<8x32xf32>
    %35 = arith.addf %33, %34 : vector<8x32xf32>
    %36 = arith.mulf %35, %28 : vector<8x32xf32>
    %cst_17 = arith.constant -0.284496725 : f32
    %37 = vector.broadcast %cst_17 : f32 to vector<8x32xf32>
    %38 = arith.addf %36, %37 : vector<8x32xf32>
    %39 = arith.mulf %38, %28 : vector<8x32xf32>
    %cst_18 = arith.constant 0.254829586 : f32
    %40 = vector.broadcast %cst_18 : f32 to vector<8x32xf32>
    %41 = arith.addf %39, %40 : vector<8x32xf32>
    %42 = arith.mulf %41, %28 : vector<8x32xf32>
    %cst_19 = arith.constant 0.000000e+00 : f32
    %43 = vector.broadcast %cst_19 : f32 to vector<8x32xf32>
    %44 = arith.subf %43, %15 : vector<8x32xf32>
    %45 = arith.mulf %44, %15 : vector<8x32xf32>
    %46 = math.exp %45 : vector<8x32xf32>
    %47 = arith.mulf %42, %46 : vector<8x32xf32>
    %cst_20 = arith.constant 1.000000e+00 : f32
    %48 = vector.broadcast %cst_20 : f32 to vector<8x32xf32>
    %49 = arith.subf %48, %47 : vector<8x32xf32>
    %50 = arith.mulf %14, %49 : vector<8x32xf32>
    %cst_21 = arith.constant 1.000000e+00 : f32
    %51 = vector.broadcast %cst_21 : f32 to vector<8x32xf32>
    %52 = arith.addf %51, %50 : vector<8x32xf32>
    %53 = arith.mulf %7, %52 : vector<8x32xf32>
    %cst_22 = arith.constant 0.000000e+00 : f32
    %54 = vector.broadcast %cst_22 : f32 to vector<8x32xf32>
    %55 = vector.extract_strided_slice %53 {offsets = [0, 0], sizes = [8, 8], strides = [1, 1]} : vector<8x32xf32> to vector<8x8xf32>
    %c0_23 = arith.constant 0 : index
    %c0_24 = arith.constant 0 : index
    %c0_25 = arith.constant 0 : index
    %56 = vector.load %arg5[%c0_23, %c0_24, %c0_25] : memref<4x8x32xf32, #tpu.memory_space<vmem>>, vector<1x8x32xf32>
    %57 = vector.shape_cast %56 : vector<1x8x32xf32> to vector<8x32xf32>
    %cst_26 = arith.constant dense<0.000000e+00> : vector<8x32xf32>
    %58 = tpu.matmul %55, %57, %cst_26 {dimension_numbers = #tpu.dot_dimension_numbers<[1], [0], [0], [1], [0, 0, 1, 1], [], []>} : vector<8x8xf32>, vector<8x32xf32>, vector<8x32xf32> -> vector<8x32xf32>
    %c0_27 = arith.constant 0 : index
    %c0_28 = arith.constant 0 : index
    %c0_29 = arith.constant 0 : index
    %59 = vector.load %arg6[%c0_27, %c0_28, %c0_29] : memref<4x1x32xf32, #tpu.memory_space<vmem>>, vector<1x1x32xf32>
    %60 = vector.shape_cast %59 : vector<1x1x32xf32> to vector<1x32xf32>
    %61 = vector.broadcast %60 : vector<1x32xf32> to vector<8x32xf32>
    %62 = arith.addf %58, %61 : vector<8x32xf32>
    %63 = arith.addf %0, %62 : vector<8x32xf32>
    %c0_30 = arith.constant 0 : index
    %c0_31 = arith.constant 0 : index
    %c0_32 = arith.constant 0 : index
    %64 = vector.load %arg7[%c0_30, %c0_31, %c0_32] : memref<4x1x32xf32, #tpu.memory_space<vmem>>, vector<1x1x32xf32>
    %65 = vector.shape_cast %64 : vector<1x1x32xf32> to vector<1x32xf32>
    %c0_33 = arith.constant 0 : index
    %c0_34 = arith.constant 0 : index
    %c0_35 = arith.constant 0 : index
    %66 = vector.load %arg8[%c0_33, %c0_34, %c0_35] : memref<4x1x32xf32, #tpu.memory_space<vmem>>, vector<1x1x32xf32>
    %67 = vector.shape_cast %66 : vector<1x1x32xf32> to vector<1x32xf32>
    %cst_36 = arith.constant dense<0.000000e+00> : vector<8xf32>
    %68 = vector.multi_reduction <add>, %63, %cst_36 [1] : vector<8x32xf32> to vector<8xf32>
    %69 = vector.shape_cast %68 : vector<8xf32> to vector<8x1xf32>
    %cst_37 = arith.constant 3.200000e+01 : f32
    %70 = vector.broadcast %cst_37 : f32 to vector<8x1xf32>
    %71 = arith.divf %69, %70 : vector<8x1xf32>
    %72 = vector.broadcast %71 : vector<8x1xf32> to vector<8x32xf32>
    %73 = arith.subf %63, %72 : vector<8x32xf32>
    %74 = arith.mulf %73, %73 : vector<8x32xf32>
    %cst_38 = arith.constant dense<0.000000e+00> : vector<8xf32>
    %75 = vector.multi_reduction <add>, %74, %cst_38 [1] : vector<8x32xf32> to vector<8xf32>
    %76 = vector.shape_cast %75 : vector<8xf32> to vector<8x1xf32>
    %cst_39 = arith.constant 3.200000e+01 : f32
    %77 = vector.broadcast %cst_39 : f32 to vector<8x1xf32>
    %78 = arith.divf %76, %77 : vector<8x1xf32>
    %79 = vector.broadcast %71 : vector<8x1xf32> to vector<8x32xf32>
    %80 = arith.subf %63, %79 : vector<8x32xf32>
    %cst_40 = arith.constant 9.99999974E-6 : f32
    %81 = vector.broadcast %cst_40 : f32 to vector<8x1xf32>
    %82 = arith.addf %78, %81 : vector<8x1xf32>
    %83 = math.rsqrt %82 : vector<8x1xf32>
    %84 = vector.broadcast %83 : vector<8x1xf32> to vector<8x32xf32>
    %85 = arith.mulf %80, %84 : vector<8x32xf32>
    %86 = vector.broadcast %65 : vector<1x32xf32> to vector<8x32xf32>
    %87 = arith.mulf %85, %86 : vector<8x32xf32>
    %88 = vector.broadcast %67 : vector<1x32xf32> to vector<8x32xf32>
    %89 = arith.addf %87, %88 : vector<8x32xf32>
    %c0_41 = arith.constant 0 : index
    %c0_42 = arith.constant 0 : index
    %90 = vector.load %arg2[%c0_41, %c0_42] : memref<8x4xf32, #tpu.memory_space<vmem>>, vector<8x1xf32>
    %91 = vector.broadcast %90 : vector<8x1xf32> to vector<8x32xf32>
    %92 = arith.mulf %89, %91 : vector<8x32xf32>
    %c0_43 = arith.constant 0 : index
    %c0_44 = arith.constant 0 : index
    %c0_45 = arith.constant 0 : index
    %93 = vector.load %arg9[%c0_43, %c0_44, %c0_45] : memref<4x32x32xf32, #tpu.memory_space<vmem>>, vector<1x32x32xf32>
    %94 = vector.shape_cast %93 : vector<1x32x32xf32> to vector<32x32xf32>
    %cst_46 = arith.constant dense<0.000000e+00> : vector<8x32xf32>
    %95 = tpu.matmul %92, %94, %cst_46 {dimension_numbers = #tpu.dot_dimension_numbers<[1], [0], [0], [1], [0, 0, 1, 1], [], []>} : vector<8x32xf32>, vector<32x32xf32>, vector<8x32xf32> -> vector<8x32xf32>
    %96 = arith.addf %54, %95 : vector<8x32xf32>
    %97 = vector.extract_strided_slice %53 {offsets = [0, 8], sizes = [8, 8], strides = [1, 1]} : vector<8x32xf32> to vector<8x8xf32>
    %c1 = arith.constant 1 : index
    %c0_47 = arith.constant 0 : index
    %c0_48 = arith.constant 0 : index
    %98 = vector.load %arg5[%c1, %c0_47, %c0_48] : memref<4x8x32xf32, #tpu.memory_space<vmem>>, vector<1x8x32xf32>
    %99 = vector.shape_cast %98 : vector<1x8x32xf32> to vector<8x32xf32>
    %cst_49 = arith.constant dense<0.000000e+00> : vector<8x32xf32>
    %100 = tpu.matmul %97, %99, %cst_49 {dimension_numbers = #tpu.dot_dimension_numbers<[1], [0], [0], [1], [0, 0, 1, 1], [], []>} : vector<8x8xf32>, vector<8x32xf32>, vector<8x32xf32> -> vector<8x32xf32>
    %c1_50 = arith.constant 1 : index
    %c0_51 = arith.constant 0 : index
    %c0_52 = arith.constant 0 : index
    %101 = vector.load %arg6[%c1_50, %c0_51, %c0_52] : memref<4x1x32xf32, #tpu.memory_space<vmem>>, vector<1x1x32xf32>
    %102 = vector.shape_cast %101 : vector<1x1x32xf32> to vector<1x32xf32>
    %103 = vector.broadcast %102 : vector<1x32xf32> to vector<8x32xf32>
    %104 = arith.addf %100, %103 : vector<8x32xf32>
    %105 = arith.addf %0, %104 : vector<8x32xf32>
    %c1_53 = arith.constant 1 : index
    %c0_54 = arith.constant 0 : index
    %c0_55 = arith.constant 0 : index
    %106 = vector.load %arg7[%c1_53, %c0_54, %c0_55] : memref<4x1x32xf32, #tpu.memory_space<vmem>>, vector<1x1x32xf32>
    %107 = vector.shape_cast %106 : vector<1x1x32xf32> to vector<1x32xf32>
    %c1_56 = arith.constant 1 : index
    %c0_57 = arith.constant 0 : index
    %c0_58 = arith.constant 0 : index
    %108 = vector.load %arg8[%c1_56, %c0_57, %c0_58] : memref<4x1x32xf32, #tpu.memory_space<vmem>>, vector<1x1x32xf32>
    %109 = vector.shape_cast %108 : vector<1x1x32xf32> to vector<1x32xf32>
    %cst_59 = arith.constant dense<0.000000e+00> : vector<8xf32>
    %110 = vector.multi_reduction <add>, %105, %cst_59 [1] : vector<8x32xf32> to vector<8xf32>
    %111 = vector.shape_cast %110 : vector<8xf32> to vector<8x1xf32>
    %cst_60 = arith.constant 3.200000e+01 : f32
    %112 = vector.broadcast %cst_60 : f32 to vector<8x1xf32>
    %113 = arith.divf %111, %112 : vector<8x1xf32>
    %114 = vector.broadcast %113 : vector<8x1xf32> to vector<8x32xf32>
    %115 = arith.subf %105, %114 : vector<8x32xf32>
    %116 = arith.mulf %115, %115 : vector<8x32xf32>
    %cst_61 = arith.constant dense<0.000000e+00> : vector<8xf32>
    %117 = vector.multi_reduction <add>, %116, %cst_61 [1] : vector<8x32xf32> to vector<8xf32>
    %118 = vector.shape_cast %117 : vector<8xf32> to vector<8x1xf32>
    %cst_62 = arith.constant 3.200000e+01 : f32
    %119 = vector.broadcast %cst_62 : f32 to vector<8x1xf32>
    %120 = arith.divf %118, %119 : vector<8x1xf32>
    %121 = vector.broadcast %113 : vector<8x1xf32> to vector<8x32xf32>
    %122 = arith.subf %105, %121 : vector<8x32xf32>
    %cst_63 = arith.constant 9.99999974E-6 : f32
    %123 = vector.broadcast %cst_63 : f32 to vector<8x1xf32>
    %124 = arith.addf %120, %123 : vector<8x1xf32>
    %125 = math.rsqrt %124 : vector<8x1xf32>
    %126 = vector.broadcast %125 : vector<8x1xf32> to vector<8x32xf32>
    %127 = arith.mulf %122, %126 : vector<8x32xf32>
    %128 = vector.broadcast %107 : vector<1x32xf32> to vector<8x32xf32>
    %129 = arith.mulf %127, %128 : vector<8x32xf32>
    %130 = vector.broadcast %109 : vector<1x32xf32> to vector<8x32xf32>
    %131 = arith.addf %129, %130 : vector<8x32xf32>
    %c0_64 = arith.constant 0 : index
    %c1_65 = arith.constant 1 : index
    %132 = vector.load %arg2[%c0_64, %c1_65] : memref<8x4xf32, #tpu.memory_space<vmem>>, vector<8x1xf32>
    %133 = vector.broadcast %132 : vector<8x1xf32> to vector<8x32xf32>
    %134 = arith.mulf %131, %133 : vector<8x32xf32>
    %c1_66 = arith.constant 1 : index
    %c0_67 = arith.constant 0 : index
    %c0_68 = arith.constant 0 : index
    %135 = vector.load %arg9[%c1_66, %c0_67, %c0_68] : memref<4x32x32xf32, #tpu.memory_space<vmem>>, vector<1x32x32xf32>
    %136 = vector.shape_cast %135 : vector<1x32x32xf32> to vector<32x32xf32>
    %cst_69 = arith.constant dense<0.000000e+00> : vector<8x32xf32>
    %137 = tpu.matmul %134, %136, %cst_69 {dimension_numbers = #tpu.dot_dimension_numbers<[1], [0], [0], [1], [0, 0, 1, 1], [], []>} : vector<8x32xf32>, vector<32x32xf32>, vector<8x32xf32> -> vector<8x32xf32>
    %138 = arith.addf %96, %137 : vector<8x32xf32>
    %139 = vector.extract_strided_slice %53 {offsets = [0, 16], sizes = [8, 8], strides = [1, 1]} : vector<8x32xf32> to vector<8x8xf32>
    %c2 = arith.constant 2 : index
    %c0_70 = arith.constant 0 : index
    %c0_71 = arith.constant 0 : index
    %140 = vector.load %arg5[%c2, %c0_70, %c0_71] : memref<4x8x32xf32, #tpu.memory_space<vmem>>, vector<1x8x32xf32>
    %141 = vector.shape_cast %140 : vector<1x8x32xf32> to vector<8x32xf32>
    %cst_72 = arith.constant dense<0.000000e+00> : vector<8x32xf32>
    %142 = tpu.matmul %139, %141, %cst_72 {dimension_numbers = #tpu.dot_dimension_numbers<[1], [0], [0], [1], [0, 0, 1, 1], [], []>} : vector<8x8xf32>, vector<8x32xf32>, vector<8x32xf32> -> vector<8x32xf32>
    %c2_73 = arith.constant 2 : index
    %c0_74 = arith.constant 0 : index
    %c0_75 = arith.constant 0 : index
    %143 = vector.load %arg6[%c2_73, %c0_74, %c0_75] : memref<4x1x32xf32, #tpu.memory_space<vmem>>, vector<1x1x32xf32>
    %144 = vector.shape_cast %143 : vector<1x1x32xf32> to vector<1x32xf32>
    %145 = vector.broadcast %144 : vector<1x32xf32> to vector<8x32xf32>
    %146 = arith.addf %142, %145 : vector<8x32xf32>
    %147 = arith.addf %0, %146 : vector<8x32xf32>
    %c2_76 = arith.constant 2 : index
    %c0_77 = arith.constant 0 : index
    %c0_78 = arith.constant 0 : index
    %148 = vector.load %arg7[%c2_76, %c0_77, %c0_78] : memref<4x1x32xf32, #tpu.memory_space<vmem>>, vector<1x1x32xf32>
    %149 = vector.shape_cast %148 : vector<1x1x32xf32> to vector<1x32xf32>
    %c2_79 = arith.constant 2 : index
    %c0_80 = arith.constant 0 : index
    %c0_81 = arith.constant 0 : index
    %150 = vector.load %arg8[%c2_79, %c0_80, %c0_81] : memref<4x1x32xf32, #tpu.memory_space<vmem>>, vector<1x1x32xf32>
    %151 = vector.shape_cast %150 : vector<1x1x32xf32> to vector<1x32xf32>
    %cst_82 = arith.constant dense<0.000000e+00> : vector<8xf32>
    %152 = vector.multi_reduction <add>, %147, %cst_82 [1] : vector<8x32xf32> to vector<8xf32>
    %153 = vector.shape_cast %152 : vector<8xf32> to vector<8x1xf32>
    %cst_83 = arith.constant 3.200000e+01 : f32
    %154 = vector.broadcast %cst_83 : f32 to vector<8x1xf32>
    %155 = arith.divf %153, %154 : vector<8x1xf32>
    %156 = vector.broadcast %155 : vector<8x1xf32> to vector<8x32xf32>
    %157 = arith.subf %147, %156 : vector<8x32xf32>
    %158 = arith.mulf %157, %157 : vector<8x32xf32>
    %cst_84 = arith.constant dense<0.000000e+00> : vector<8xf32>
    %159 = vector.multi_reduction <add>, %158, %cst_84 [1] : vector<8x32xf32> to vector<8xf32>
    %160 = vector.shape_cast %159 : vector<8xf32> to vector<8x1xf32>
    %cst_85 = arith.constant 3.200000e+01 : f32
    %161 = vector.broadcast %cst_85 : f32 to vector<8x1xf32>
    %162 = arith.divf %160, %161 : vector<8x1xf32>
    %163 = vector.broadcast %155 : vector<8x1xf32> to vector<8x32xf32>
    %164 = arith.subf %147, %163 : vector<8x32xf32>
    %cst_86 = arith.constant 9.99999974E-6 : f32
    %165 = vector.broadcast %cst_86 : f32 to vector<8x1xf32>
    %166 = arith.addf %162, %165 : vector<8x1xf32>
    %167 = math.rsqrt %166 : vector<8x1xf32>
    %168 = vector.broadcast %167 : vector<8x1xf32> to vector<8x32xf32>
    %169 = arith.mulf %164, %168 : vector<8x32xf32>
    %170 = vector.broadcast %149 : vector<1x32xf32> to vector<8x32xf32>
    %171 = arith.mulf %169, %170 : vector<8x32xf32>
    %172 = vector.broadcast %151 : vector<1x32xf32> to vector<8x32xf32>
    %173 = arith.addf %171, %172 : vector<8x32xf32>
    %c0_87 = arith.constant 0 : index
    %c2_88 = arith.constant 2 : index
    %174 = vector.load %arg2[%c0_87, %c2_88] : memref<8x4xf32, #tpu.memory_space<vmem>>, vector<8x1xf32>
    %175 = vector.broadcast %174 : vector<8x1xf32> to vector<8x32xf32>
    %176 = arith.mulf %173, %175 : vector<8x32xf32>
    %c2_89 = arith.constant 2 : index
    %c0_90 = arith.constant 0 : index
    %c0_91 = arith.constant 0 : index
    %177 = vector.load %arg9[%c2_89, %c0_90, %c0_91] : memref<4x32x32xf32, #tpu.memory_space<vmem>>, vector<1x32x32xf32>
    %178 = vector.shape_cast %177 : vector<1x32x32xf32> to vector<32x32xf32>
    %cst_92 = arith.constant dense<0.000000e+00> : vector<8x32xf32>
    %179 = tpu.matmul %176, %178, %cst_92 {dimension_numbers = #tpu.dot_dimension_numbers<[1], [0], [0], [1], [0, 0, 1, 1], [], []>} : vector<8x32xf32>, vector<32x32xf32>, vector<8x32xf32> -> vector<8x32xf32>
    %180 = arith.addf %138, %179 : vector<8x32xf32>
    %181 = vector.extract_strided_slice %53 {offsets = [0, 24], sizes = [8, 8], strides = [1, 1]} : vector<8x32xf32> to vector<8x8xf32>
    %c3 = arith.constant 3 : index
    %c0_93 = arith.constant 0 : index
    %c0_94 = arith.constant 0 : index
    %182 = vector.load %arg5[%c3, %c0_93, %c0_94] : memref<4x8x32xf32, #tpu.memory_space<vmem>>, vector<1x8x32xf32>
    %183 = vector.shape_cast %182 : vector<1x8x32xf32> to vector<8x32xf32>
    %cst_95 = arith.constant dense<0.000000e+00> : vector<8x32xf32>
    %184 = tpu.matmul %181, %183, %cst_95 {dimension_numbers = #tpu.dot_dimension_numbers<[1], [0], [0], [1], [0, 0, 1, 1], [], []>} : vector<8x8xf32>, vector<8x32xf32>, vector<8x32xf32> -> vector<8x32xf32>
    %c3_96 = arith.constant 3 : index
    %c0_97 = arith.constant 0 : index
    %c0_98 = arith.constant 0 : index
    %185 = vector.load %arg6[%c3_96, %c0_97, %c0_98] : memref<4x1x32xf32, #tpu.memory_space<vmem>>, vector<1x1x32xf32>
    %186 = vector.shape_cast %185 : vector<1x1x32xf32> to vector<1x32xf32>
    %187 = vector.broadcast %186 : vector<1x32xf32> to vector<8x32xf32>
    %188 = arith.addf %184, %187 : vector<8x32xf32>
    %189 = arith.addf %0, %188 : vector<8x32xf32>
    %c3_99 = arith.constant 3 : index
    %c0_100 = arith.constant 0 : index
    %c0_101 = arith.constant 0 : index
    %190 = vector.load %arg7[%c3_99, %c0_100, %c0_101] : memref<4x1x32xf32, #tpu.memory_space<vmem>>, vector<1x1x32xf32>
    %191 = vector.shape_cast %190 : vector<1x1x32xf32> to vector<1x32xf32>
    %c3_102 = arith.constant 3 : index
    %c0_103 = arith.constant 0 : index
    %c0_104 = arith.constant 0 : index
    %192 = vector.load %arg8[%c3_102, %c0_103, %c0_104] : memref<4x1x32xf32, #tpu.memory_space<vmem>>, vector<1x1x32xf32>
    %193 = vector.shape_cast %192 : vector<1x1x32xf32> to vector<1x32xf32>
    %cst_105 = arith.constant dense<0.000000e+00> : vector<8xf32>
    %194 = vector.multi_reduction <add>, %189, %cst_105 [1] : vector<8x32xf32> to vector<8xf32>
    %195 = vector.shape_cast %194 : vector<8xf32> to vector<8x1xf32>
    %cst_106 = arith.constant 3.200000e+01 : f32
    %196 = vector.broadcast %cst_106 : f32 to vector<8x1xf32>
    %197 = arith.divf %195, %196 : vector<8x1xf32>
    %198 = vector.broadcast %197 : vector<8x1xf32> to vector<8x32xf32>
    %199 = arith.subf %189, %198 : vector<8x32xf32>
    %200 = arith.mulf %199, %199 : vector<8x32xf32>
    %cst_107 = arith.constant dense<0.000000e+00> : vector<8xf32>
    %201 = vector.multi_reduction <add>, %200, %cst_107 [1] : vector<8x32xf32> to vector<8xf32>
    %202 = vector.shape_cast %201 : vector<8xf32> to vector<8x1xf32>
    %cst_108 = arith.constant 3.200000e+01 : f32
    %203 = vector.broadcast %cst_108 : f32 to vector<8x1xf32>
    %204 = arith.divf %202, %203 : vector<8x1xf32>
    %205 = vector.broadcast %197 : vector<8x1xf32> to vector<8x32xf32>
    %206 = arith.subf %189, %205 : vector<8x32xf32>
    %cst_109 = arith.constant 9.99999974E-6 : f32
    %207 = vector.broadcast %cst_109 : f32 to vector<8x1xf32>
    %208 = arith.addf %204, %207 : vector<8x1xf32>
    %209 = math.rsqrt %208 : vector<8x1xf32>
    %210 = vector.broadcast %209 : vector<8x1xf32> to vector<8x32xf32>
    %211 = arith.mulf %206, %210 : vector<8x32xf32>
    %212 = vector.broadcast %191 : vector<1x32xf32> to vector<8x32xf32>
    %213 = arith.mulf %211, %212 : vector<8x32xf32>
    %214 = vector.broadcast %193 : vector<1x32xf32> to vector<8x32xf32>
    %215 = arith.addf %213, %214 : vector<8x32xf32>
    %c0_110 = arith.constant 0 : index
    %c3_111 = arith.constant 3 : index
    %216 = vector.load %arg2[%c0_110, %c3_111] : memref<8x4xf32, #tpu.memory_space<vmem>>, vector<8x1xf32>
    %217 = vector.broadcast %216 : vector<8x1xf32> to vector<8x32xf32>
    %218 = arith.mulf %215, %217 : vector<8x32xf32>
    %c3_112 = arith.constant 3 : index
    %c0_113 = arith.constant 0 : index
    %c0_114 = arith.constant 0 : index
    %219 = vector.load %arg9[%c3_112, %c0_113, %c0_114] : memref<4x32x32xf32, #tpu.memory_space<vmem>>, vector<1x32x32xf32>
    %220 = vector.shape_cast %219 : vector<1x32x32xf32> to vector<32x32xf32>
    %cst_115 = arith.constant dense<0.000000e+00> : vector<8x32xf32>
    %221 = tpu.matmul %218, %220, %cst_115 {dimension_numbers = #tpu.dot_dimension_numbers<[1], [0], [0], [1], [0, 0, 1, 1], [], []>} : vector<8x32xf32>, vector<32x32xf32>, vector<8x32xf32> -> vector<8x32xf32>
    %222 = arith.addf %180, %221 : vector<8x32xf32>
    %223 = arith.addf %0, %222 : vector<8x32xf32>
    %c0_116 = arith.constant 0 : index
    %c0_117 = arith.constant 0 : index
    %224 = vector.load %arg10[%c0_116, %c0_117] : memref<1x32xf32, #tpu.memory_space<vmem>>, vector<1x32xf32>
    %225 = vector.broadcast %224 : vector<1x32xf32> to vector<8x32xf32>
    %226 = arith.addf %223, %225 : vector<8x32xf32>
    %c0_118 = arith.constant 0 : index
    %c0_119 = arith.constant 0 : index
    %227 = vector.load %arg11[%c0_118, %c0_119] : memref<1x32xf32, #tpu.memory_space<vmem>>, vector<1x32xf32>
    %c0_120 = arith.constant 0 : index
    %c0_121 = arith.constant 0 : index
    %228 = vector.load %arg12[%c0_120, %c0_121] : memref<1x32xf32, #tpu.memory_space<vmem>>, vector<1x32xf32>
    %cst_122 = arith.constant dense<0.000000e+00> : vector<8xf32>
    %229 = vector.multi_reduction <add>, %226, %cst_122 [1] : vector<8x32xf32> to vector<8xf32>
    %230 = vector.shape_cast %229 : vector<8xf32> to vector<8x1xf32>
    %cst_123 = arith.constant 3.200000e+01 : f32
    %231 = vector.broadcast %cst_123 : f32 to vector<8x1xf32>
    %232 = arith.divf %230, %231 : vector<8x1xf32>
    %233 = vector.broadcast %232 : vector<8x1xf32> to vector<8x32xf32>
    %234 = arith.subf %226, %233 : vector<8x32xf32>
    %235 = arith.mulf %234, %234 : vector<8x32xf32>
    %cst_124 = arith.constant dense<0.000000e+00> : vector<8xf32>
    %236 = vector.multi_reduction <add>, %235, %cst_124 [1] : vector<8x32xf32> to vector<8xf32>
    %237 = vector.shape_cast %236 : vector<8xf32> to vector<8x1xf32>
    %cst_125 = arith.constant 3.200000e+01 : f32
    %238 = vector.broadcast %cst_125 : f32 to vector<8x1xf32>
    %239 = arith.divf %237, %238 : vector<8x1xf32>
    %240 = vector.broadcast %232 : vector<8x1xf32> to vector<8x32xf32>
    %241 = arith.subf %226, %240 : vector<8x32xf32>
    %cst_126 = arith.constant 9.99999974E-6 : f32
    %242 = vector.broadcast %cst_126 : f32 to vector<8x1xf32>
    %243 = arith.addf %239, %242 : vector<8x1xf32>
    %244 = math.rsqrt %243 : vector<8x1xf32>
    %245 = vector.broadcast %244 : vector<8x1xf32> to vector<8x32xf32>
    %246 = arith.mulf %241, %245 : vector<8x32xf32>
    %247 = vector.broadcast %227 : vector<1x32xf32> to vector<8x32xf32>
    %248 = arith.mulf %246, %247 : vector<8x32xf32>
    %249 = vector.broadcast %228 : vector<1x32xf32> to vector<8x32xf32>
    %250 = arith.addf %248, %249 : vector<8x32xf32>
    %c0_127 = arith.constant 0 : index
    %c0_128 = arith.constant 0 : index
    %251 = vector.load %arg13[%c0_127, %c0_128] : memref<8x32xf32, #tpu.memory_space<vmem>>, vector<8x32xf32>
    tpu.vector_store %arg13[%c0_127, %c0_128], %250 {strides = array<i32>} : memref<8x32xf32, #tpu.memory_space<vmem>>, vector<8x32xf32>,
    return
  }
  func.func @transform_0(%arg0: i32) -> (i32, i32) {
    %c0_i32 = arith.constant 0 : i32
    %c0_i32_0 = arith.constant 0 : i32
    return %arg0, %c0_i32 : i32, i32
  }
  func.func @transform_1(%arg0: i32) -> (i32, i32) {
    %c0_i32 = arith.constant 0 : i32
    %c0_i32_0 = arith.constant 0 : i32
    return %arg0, %c0_i32 : i32, i32
  }
  func.func @transform_2(%arg0: i32) -> (i32, i32) {
    %c0_i32 = arith.constant 0 : i32
    %c0_i32_0 = arith.constant 0 : i32
    %c0_i32_1 = arith.constant 0 : i32
    return %c0_i32, %c0_i32_0 : i32, i32
  }
  func.func @transform_3(%arg0: i32) -> (i32, i32) {
    %c0_i32 = arith.constant 0 : i32
    %c0_i32_0 = arith.constant 0 : i32
    %c0_i32_1 = arith.constant 0 : i32
    return %c0_i32, %c0_i32_0 : i32, i32
  }
  func.func @transform_4(%arg0: i32) -> (i32, i32, i32) {
    %c0_i32 = arith.constant 0 : i32
    %c0_i32_0 = arith.constant 0 : i32
    %c0_i32_1 = arith.constant 0 : i32
    %c0_i32_2 = arith.constant 0 : i32
    return %c0_i32, %c0_i32_0, %c0_i32_1 : i32, i32, i32
  }
  func.func @transform_5(%arg0: i32) -> (i32, i32, i32) {
    %c0_i32 = arith.constant 0 : i32
    %c0_i32_0 = arith.constant 0 : i32
    %c0_i32_1 = arith.constant 0 : i32
    %c0_i32_2 = arith.constant 0 : i32
    return %c0_i32, %c0_i32_0, %c0_i32_1 : i32, i32, i32
  }
  func.func @transform_6(%arg0: i32) -> (i32, i32, i32) {
    %c0_i32 = arith.constant 0 : i32
    %c0_i32_0 = arith.constant 0 : i32
    %c0_i32_1 = arith.constant 0 : i32
    %c0_i32_2 = arith.constant 0 : i32
    return %c0_i32, %c0_i32_0, %c0_i32_1 : i32, i32, i32
  }
  func.func @transform_7(%arg0: i32) -> (i32, i32, i32) {
    %c0_i32 = arith.constant 0 : i32
    %c0_i32_0 = arith.constant 0 : i32
    %c0_i32_1 = arith.constant 0 : i32
    %c0_i32_2 = arith.constant 0 : i32
    return %c0_i32, %c0_i32_0, %c0_i32_1 : i32, i32, i32
  }
  func.func @transform_8(%arg0: i32) -> (i32, i32, i32) {
    %c0_i32 = arith.constant 0 : i32
    %c0_i32_0 = arith.constant 0 : i32
    %c0_i32_1 = arith.constant 0 : i32
    %c0_i32_2 = arith.constant 0 : i32
    return %c0_i32, %c0_i32_0, %c0_i32_1 : i32, i32, i32
  }
  func.func @transform_9(%arg0: i32) -> (i32, i32) {
    %c0_i32 = arith.constant 0 : i32
    %c0_i32_0 = arith.constant 0 : i32
    %c0_i32_1 = arith.constant 0 : i32
    return %c0_i32, %c0_i32_0 : i32, i32
  }
  func.func @transform_10(%arg0: i32) -> (i32, i32) {
    %c0_i32 = arith.constant 0 : i32
    %c0_i32_0 = arith.constant 0 : i32
    %c0_i32_1 = arith.constant 0 : i32
    return %c0_i32, %c0_i32_0 : i32, i32
  }
  func.func @transform_11(%arg0: i32) -> (i32, i32) {
    %c0_i32 = arith.constant 0 : i32
    %c0_i32_0 = arith.constant 0 : i32
    %c0_i32_1 = arith.constant 0 : i32
    return %c0_i32, %c0_i32_0 : i32, i32
  }
  func.func @transform_12(%arg0: i32) -> (i32, i32) {
    %c0_i32 = arith.constant 0 : i32
    %c0_i32_0 = arith.constant 0 : i32
    return %arg0, %c0_i32 : i32, i32
  }
}

</mosaic_0001>

<bundles_post_ra>
// kernel: tpu_custom_call.1
= control target key start
LH: loop header
LB: loop body
LE: loop exit
PB: predicated region body
PF: predicated region fallthrough
CT: control target
= control target key end

     0   :  { %s1893_s0 = inlined_call_operand.vmem [shape: f32[16,32], index: 0, kind: input, shape index: {}]   ;;  %s1894_s1 = inlined_call_operand.vmem [shape: f32[16,4], index: 1, kind: input, shape index: {}]   ;;  %s1895_s2 = inlined_call_operand.hbm [shape: f32[32,32], index: 2, kind: input, shape index: {}]   ;;  %s1896_s3 = inlined_call_operand.hbm [shape: f32[1,32], index: 3, kind: input, shape index: {}]   ;;  %s1897_s4 = inlined_call_operand.hbm [shape: f32[4,8,32], index: 4, kind: input, shape index: {}]   ;;  %s1898_s5 = inlined_call_operand.vmem [shape: f32[4,1,32], index: 5, kind: input, shape index: {}]   ;;  %s1899_s6 = inlined_call_operand.vmem [shape: f32[4,1,32], index: 6, kind: input, shape index: {}]   ;;  %s1900_s7 = inlined_call_operand.hbm [shape: f32[4,1,32], index: 7, kind: input, shape index: {}]   ;;  %s1901_s8 = inlined_call_operand.hbm [shape: f32[4,32,32], index: 8, kind: input, shape index: {}]   ;;  %s1902_s9 = inlined_call_operand.vmem [shape: f32[1,32], index: 9, kind: input, shape index: {}]   ;;  %s1903_s10 = inlined_call_operand.vmem [shape: f32[1,32], index: 10, kind: input, shape index: {}]   ;;  %s1904_s11 = inlined_call_operand.vmem [shape: f32[1,32], index: 11, kind: input, shape index: {}]   ;;  %s1905_s12 = inlined_call_operand.hbm [shape: f32[16,32], index: 12, kind: output, shape index: {}]  }
   0x1   :  { %1912 = sst [smem:[#allocation22_spill]] %s1896_s3 }
   0x2   :  { %1913 = sst [smem:[#allocation23_spill]] %s1900_s7 }
   0x3   :  { %17 = vsyncpa [#allocation3], 0 }
   0x4   :  { %18 = vsyncpa [#allocation6], 0 }
   0x5   :  { %19 = vsyncpa [#allocation9], 0 }
   0x6   :  { %20 = vsyncpa [#allocation4], 0 }
   0x7   :  { %22 = vsyncpa [#allocation4 + $0x1], 0  ;;  %s1646_s21 = smov 0   ;;  %s1648_s22 = smov 0  }
   0x8   :  { %s1650_s23 = smov 0   ;;  %s1652_s24 = smov 0  }
   0x9 LB: > { %1914 = sst [smem:[#allocation16_spill]] %s1548_s21  ;;  %s1667_s25 = sadd.s32 4294967295, %s1560_s24   ;;  %s1560_s24 = sphi %s1652_s24, %s1929_s24   ;;  %s1556_s23 = sphi %s1650_s23, %s1931_s23   ;;  %s1552_s22 = sphi %s1648_s22, %s1933_s22   ;;  %s1548_s21 = sphi %s1646_s21, %s1932_s21  }
   0xa   : > { %1915 = sst [smem:[#allocation17_spill]] %s1556_s23  ;;  %s1157_s26 = sadd.s32 4294967294, %s1560_s24  }
   0xb   : > { %1916 = sst [smem:[#allocation18_spill]] %s1560_s24  ;;  %s1671_s27 = sadd.s32 1, %s1560_s24  }
   0xc   : > { %1917 = sst [smem:[#allocation19_spill]] %s1671_s27  ;;  %s297_s28 = sadd.s32 1, %s1556_s23 }
   0xd   : > { %s294_s29 = ssub.s32 %s1560_s24, %s1671_s27  ;;  %p307_p0 = scmp.ne.s32.totalorder %s1556_s23, %s1552_s22 }
   0xe   : > { %p295_p1 = scmp.eq.s32.totalorder %s294_s29, 0  ;;  %p308_p2 = scmp.eq.s32.totalorder %s1667_s25, 1 }
   0xf   : > { %p313_p3 = scmp.ne.s32.totalorder %s1552_s22, %s1548_s21  ;;  %p314_p4 = scmp.eq.s32.totalorder %s1157_s26, 1 }
  0x10   : > { %s1682_s30 = scalar_select %p295_p1, %s1556_s23, %s297_s28  }
  0x11   : > { %p1684_p5 = por %p308_p2, %p307_p0  ;;  %p1688_p6 = por %p314_p4, %p313_p3 }
  0x12   : > { %1918 = sst [smem:[#allocation20_spill]] %s1682_s30  ;;  %p1158_p7 = scmp.ge.s32.totalorder %s1560_s24, 1 }
  0x13   : > { %s1920_s14 = scalar_select %p1688_p6, 1, 0 }
  0x14   : > { %p321_p8 = scmp.lt.s32.totalorder %s1560_s24, 3  ;;  %p1235_p9 = scmp.eq.s32.totalorder %s1667_s25, 0 }
  0x15   : > { %1921 = sst [smem:[#allocation21_spill]] %s1920_s14  ;;  %s1562_s19 = smov [#allocation5]  }
  0x16   : > { %p1695_p10 = pnand %p1158_p7, %p321_p8  ;;  %s1923_s3 = sld [smem:[#allocation22_spill]] }
  0x17   : > { %s349_s20 = sshll.u32 %s1562_s19, 4  ;;  %s1924_s7 = sld [smem:[#allocation23_spill]]  ;;  %s350_s20 = int_to_ptr.vmem [resolvable:$true] %s349_s20 }
  0x18   : > { %p1215_p11 = pneg %p1695_p10  ;;  %s1563_s16 = smov [#allocation8]  }
  0x19   : > { %s380_s17 = sshll.u32 %s1563_s16, 4  ;;  %s1564_s19 = smov 16   ;;  %s381_s17 = int_to_ptr.vmem [resolvable:$true] %s380_s17 }
  0x1a   : > { %p1709_p12 = pnand %p1235_p9, %p1215_p11  ;;  %s1566_s23 = smov [#allocation2]  }
  0x1b   : > { %s334_s27 = sshll.u32 %s1566_s23, 4  ;;  %s358_s16 = sshll.u32 %s1897_s4, 4  ;;  %s335_s27 = int_to_ptr.vmem [resolvable:$true] %s334_s27  ;;  %s359_s16 = int_to_ptr.hbm [resolvable:$true] %s358_s16 }
  0x1c   : > { %s347_s18 = sshll.u32 %s1923_s3, 4  ;;  %s1565_s3 = smov 1   ;;  %s348_s18 = int_to_ptr.hbm [resolvable:$true] %s347_s18 }
  0x1d   : > { %s378_s29 = sshll.u32 %s1924_s7, 4  ;;  %s332_s7 = sshll.u32 %s1895_s2, 4  ;;  %s379_s29 = int_to_ptr.hbm [resolvable:$true] %s378_s29  ;;  %s333_s7 = int_to_ptr.hbm [resolvable:$true] %s332_s7 }
  0x1e   : > { %1221 = dma.hbm_to_vmem [thread:$0]  (!%p1709_p12), %s348_s18, 16, %s350_s20, [#allocation6]  }
  0x1f   : > { %1227 = dma.hbm_to_vmem [thread:$0]  (!%p1709_p12), %s379_s29, 64, %s381_s17, [#allocation9], %s1564_s19, %s1564_s19, %s1565_s3  }
  0x20   : > { %s1567_s18 = smov 128   ;;  %s1568_s20 = smov 8  }
  0x21   : > { %1218 = dma.hbm_to_vmem [thread:$0]  (!%p1709_p12), %s333_s7, 512, %s335_s27, [#allocation3], %s1567_s18, %s1567_s18, %s1568_s20  }
  0x22   : > { %s1569_s24 = smov [#allocation7]   ;;  %s392_s19 = sshll.u32 %s1901_s8, 4  ;;  %s393_s19 = int_to_ptr.hbm [resolvable:$true] %s392_s19 }
  0x23   : > { %s360_s3 = sshll.u32 %s1569_s24, 4  ;;  %s1570_s23 = smov [#allocation10]   ;;  %s361_s3 = int_to_ptr.vmem [resolvable:$true] %s360_s3 }
  0x24   : > { %1224 = dma.hbm_to_vmem [thread:$0]  (!%p1709_p12), %s359_s16, 512, %s361_s3, [#allocation6], %s1567_s18, %s1567_s18, %s1568_s20  }
  0x25   : > { %s394_s26 = sshll.u32 %s1570_s23, 4  ;;  %433 = sbr.rel (%p1695_p10) target bundleno = 1576 (0x628), region = 68  ;;  %s395_s26 = int_to_ptr.vmem [resolvable:$true] %s394_s26 }
  0x26   : > { %1230 = dma.hbm_to_vmem [thread:$0]  (!%p1709_p12), %s393_s19, 2048, %s395_s26, [#allocation9], %s1567_s18, %s1567_s18, %s1568_s20  }
  0x2a   : > { %1531 = dma.done.wait (%p1235_p9), [#allocation3], 512  }
  0x2b   : > { %1533 = vsyncadd (%p1235_p9), [#allocation3], 4294966784 }
  0x2c   : > { %1535 = dma.done.wait (%p1235_p9), [#allocation6], 528  }
  0x2d   : > { %1537 = vsyncadd (%p1235_p9), [#allocation6], 4294966768 }
  0x2e   : > { %1539 = dma.done.wait (%p1235_p9), [#allocation9], 2112  }
  0x2f   : > { %1541 = vsyncadd (%p1235_p9), [#allocation9], 4294965184  ;;  %p499_p13 = scmp.lt.s32.totalorder %s1667_s25, 1  ;;  %v511_v0 = vld [vmem:[#allocation2 + $0x18] sm:$0xff]  ;;  %v510_v1 = vld [vmem:[#allocation2 + $0x10] sm:$0xff]  ;;  %vm516_vm0 = vcmask 261120  }
  0x30   : > { %532 = vmatpush.msra.mxu0 %v511_v0  ;;  %v509_v2 = vld [vmem:[#allocation2 + $0x8] sm:$0xff]  ;;  %v508_v3 = vld [vmem:[#allocation2] sm:$0xff]  ;;  %v1571_v5 = vmov 1.4142135   ;;  %v1572_v42 = vmov -1.0   ;;  %vm584_vm3 = vcmask 64512  }
  0x31   : > { %s1748_s7 = scalar_select %p499_p13, %s1667_s25, 1  ;;  %1318 = vrcp.f32 %v1571_v5  ;;  %v1302_v11 = vld [vmem:[#allocation5] ss:$0 sm:$0xff]  ;;  %v579_v24 = vld [vmem:[#allocation7] sm:$0xff]  ;;  %v660_v48 = vld [vmem:[#allocation7 + $0x8] sm:$0xff]  ;;  %v1576_v57 = vmov 32.0  }
  0x32   : > { %533 = vmatpush.msra.mxu0 %v510_v1  ;;  %603 = vmatpush.msra.mxu1 %v579_v24  ;;  %s1573_s14 = smov 112   ;;  %s1574_s15 = smov 120   ;;  %v782_v49 = vld [vmem:[#allocation7 + $0x10] sm:$0xff]  ;;  %v1303_v52 = vld [vmem:[%s1898_s5] ss:$0 sm:$0xff] }
  0x33   : > { %s1172_s21 = sshll.u32 %s1748_s7, 3  ;;  %s1575_s28 = smov 104   ;;  %685 = vmatpush.msra.mxu2 %v660_v48  ;;  %v1304_v0 = vld [vmem:[%s1898_s5 + $0x1] ss:$0 sm:$0xff]  ;;  %v1308_v48 = vld [vmem:[%s1898_s5 + $0x3] ss:$0 sm:$0xff] }
  0x34   : > { %s502_s30 = scalar_lea.vmem %s1893_s0, %s1172_s21  ;;  %534 = vmatpush.msra.mxu0 %v509_v2  ;;  %s506_s19 = scalar_lea.vmem %s1894_s1, %s1172_s21  ;;  %v734_v24 = vld [vmem:[#allocation10 + $0x38] sm:$0xff] }
  0x35   : > { %v1756_v4 = vld [vmem:[%s502_s30] sm:$0xff]  ;;  %807 = vmatpush.msrb.mxu2 %v782_v49  ;;  %750 = vmatpush.msra.mxu3 %v734_v24  ;;  %s496_s29 = sand.u32 1, %s1552_s22  }
  0x36   : > { %535 = vmatpush.msra.mxu0 %v508_v3  ;;  %s1171_s17 = sshll.u32 %s496_s29, 3 }
  0x37   : > { %1174 = vmatmul.msk.f32.vlgmr.msra.gmra.mxu0 %vm516_vm0, %v1756_v4  ;;  %v1319_v6 = vpop.eup %1318 }
  0x38   : > { %v542_v7 = vmul.f32 1.4142135, %v1319_v6  ;;  %vm546_vm1 = vweird.f32 %v1319_v6 }
  0x3a   : > { %v543_v8 = vsub.f32 1.0, %v542_v7 }
  0x3c   : > { %v544_v9 = vmul.f32 %v1319_v6, %v543_v8 }
  0x3e   : > { %v545_v10 = vadd.f32 %v1319_v6, %v544_v9 }
  0x40   : > { %v547_v13 = vsel %vm546_vm1, %v1319_v6, %v545_v10 }
  0xb4   : > { %v537_v12 = vpop.f32.mrf.mxu0 }
  0xb5   : > { %v538_v14 = vadd.f32 %v1302_v11, %v537_v12  ;;  %v1577_v12 = vmov 1  }
  0xb6   : > { %1297 = vset.pattern.permute.xlu1 %v1577_v12 }
  0xb7   : > { %v548_v15 = vmul.f32 %v547_v13, %v538_v14  ;;  %v540_v45 = vmul.f32 0.5, %v538_v14 }
  0xb9   : > { %v551_v16 = vand.u32 2147483647, %v548_v15  ;;  %vm549_vm2 = vcmp.ge.f32.partialorder %v548_v15, 0.0 }
  0xba   : > { %v550_v43 = vsel %vm549_vm2, 1.0, %v1572_v42 }
  0xbb   : > { %v552_v17 = vmul.f32 0.3275911, %v551_v16  ;;  %v570_v27 = vsub.f32 0.0, %v551_v16 }
  0xbd   : > { %v553_v18 = vadd.f32 1.0, %v552_v17  ;;  %v571_v30 = vmul.f32 %v570_v27, %v551_v16  ;;  %v731_v27 = vld [vmem:[#allocation10 + $0x20] sm:$0xff] }
  0xbf   : > { %1320 = vrcp.f32 %v553_v18  ;;  %v572_v33 = vmul.f32 1.442695, %v571_v30 }
  0xc1   : > { %1322 = vpow2.f32 %v572_v33 }
  0xc2   : > { %1324 = vrcp.f32 %v1576_v57 }
  0xc5   : > { %v1321_v19 = vpop.eup %1320 }
  0xc6   : > { %v555_v20 = vmul.f32 %v1321_v19, %v553_v18 }
  0xc7   : > { %v1323_v39 = vpop.eup %1322 }
  0xc8   : > { %v556_v21 = vsub.f32 2.0, %v555_v20  ;;  %v1325_v58 = vpop.eup %1324 }
  0xc9   : > { %v615_v59 = vmul.f32 32.0, %v1325_v58  ;;  %vm619_vm4 = vweird.f32 %v1325_v58 }
  0xca   : > { %v557_v22 = vmul.f32 %v1321_v19, %v556_v21  ;;  %v1305_v19 = vld [vmem:[%s1898_s5 + $0x2] ss:$0 sm:$0xff] }
  0xcb   : > { %v616_v60 = vsub.f32 1.0, %v615_v59 }
  0xcc   : > { %v558_v23 = vmul.f32 %v557_v22, %v553_v18  ;;  %v1790_v18 = vld [vmem:[%s506_s19] sm:$0xff]  ;;  %s1190_s19 = sshll.u32 %s1667_s25, 3 }
  0xcd   : > { %v617_v61 = vmul.f32 %v1325_v58, %v616_v60  ;;  %s1031_s24 = scalar_lea.hbm %s1905_s12, %s1190_s19 }
  0xce   : > { %v559_v25 = vsub.f32 2.0, %v558_v23 }
  0xcf   : > { %v618_v63 = vadd.f32 %v1325_v58, %v617_v61  ;;  %v658_v61 = vld [vmem:[#allocation10 + $0x18] sm:$0xff] }
  0xd0   : > { %v560_v26 = vmul.f32 %v559_v25, %v557_v22  ;;  %v733_v25 = vld [vmem:[#allocation10 + $0x30] sm:$0xff]  ;;  %773 = vmatpush.msrb.mxu1 %v658_v61  ;;  %v1314_v61 = vld [vmem:[#allocation8 + $0x3] ss:$0 sm:$0xff] }
  0xd1   : > { %v1773_v1 = vsel %vm619_vm4, %v1325_v58, %v618_v63  ;;  %751 = vmatpush.msra.mxu3 %v733_v25  ;;  %v657_v63 = vld [vmem:[#allocation10 + $0x10] sm:$0xff] }
  0xd2   : > { %v561_v28 = vmul.f32 1.0614054, %v560_v26  ;;  %774 = vmatpush.msrb.mxu1 %v657_v63 }
  0xd4   : > { %v562_v29 = vadd.f32 -1.4531521, %v561_v28  ;;  %v882_v28 = vld [vmem:[#allocation7 + $0x18] sm:$0xff] }
  0xd6   : > { %v563_v31 = vmul.f32 %v562_v29, %v560_v26 }
  0xd8   : > { %v564_v32 = vadd.f32 1.4214138, %v563_v31 }
  0xda   : > { %v565_v34 = vmul.f32 %v564_v32, %v560_v26 }
  0xdc   : > { %v566_v35 = vadd.f32 -0.28449672, %v565_v34 }
  0xde   : > { %v567_v36 = vmul.f32 %v566_v35, %v560_v26 }
  0xe0   : > { %v568_v37 = vadd.f32 0.2548296, %v567_v36 }
  0xe2   : > { %v569_v38 = vmul.f32 %v568_v37, %v560_v26  ;;  %v732_v26 = vld [vmem:[#allocation10 + $0x28] sm:$0xff] }
  0xe3   : > { %752 = vmatpush.msra.mxu3 %v732_v26 }
  0xe4   : > { %v574_v40 = vmul.f32 %v1323_v39, %v569_v38  ;;  %v1306_v38 = vld [vmem:[%s1899_s6 + $0x1] ss:$0 sm:$0xff] }
  0xe5   : > { %753 = vmatpush.msra.mxu3 %v731_v27 }
  0xe6   : > { %v575_v41 = vsub.f32 1.0, %v574_v40 }
  0xe7   : > { %907 = vmatpush.msrb.mxu3 %v882_v28 }
  0xe8   : > { %v576_v44 = vmul.f32 %v575_v41, %v550_v43  ;;  %v1307_v41 = vld [vmem:[#allocation8 + $0x1] ss:$0 sm:$0xff] }
  0xea   : > { %v577_v46 = vadd.f32 1.0, %v576_v44 }
  0xec   : > { %v578_v47 = vmul.f32 %v577_v46, %v540_v45  ;;  %v1578_v46 = vmov 0  }
  0xed   : > { %1298 = vset.pattern.permute.xlu0 %v1578_v46 }
  0xee   : > { %788 = vrot.lane.b32.xlu2 %v578_v47, %s1573_s14  ;;  %666 = vrot.lane.b32.xlu0 %v578_v47, %s1574_s15  ;;  %s498_s14 = scalar_lea.vmem [#allocation11], %s1171_s17  ;;  %s1035_s15 = sshll.u32 %s1031_s24, 4  ;;  %s1036_s15 = int_to_ptr.hbm [resolvable:$true] %s1035_s15 }
  0xef   : > { %1175 = vmatmul.msk.f32.vlgmr.msra.gmra.mxu1 %vm584_vm3, %v578_v47  ;;  %s1033_s25 = sshll.u32 %s498_s14, 4  ;;  %s1500_s16 = sshra.s32 %s1036_s15, 4  ;;  %s1034_s25 = int_to_ptr.vmem [resolvable:$true] %s1033_s25  ;;  %s1501_s16 = int_to_ptr.hbm [resolvable:$true] %s1500_s16 }
  0xf0   : > { %s1502_s18 = scalar_lea.hbm %s1501_s16, 8  ;;  %s1506_s17 = scalar_lea.hbm %s1905_s12, 16 }
  0xf1   : > { %p1503_p0 = scmp.ne.s32.totalorder %s1501_s16, %s1502_s18  ;;  %p1507_p3 = scmp.lt.s32.totalorder %s1501_s16, %s1905_s12 }
  0xf2   : > { %p1508_p4 = scmp.lt.s32.totalorder %s1506_s17, %s1502_s18 }
  0xf3   : > { %p1504_p1 = pnand %p1503_p0, %p1684_p5 }
  0xf4   : > { %p1509_p7 = por %p1508_p4, %p1507_p3 }
  0xf5   : > { %p1505_p2 = pneg %p1504_p1 }
  0xf6   : > { %888 = vrot.lane.b32.xlu2 %v578_v47, %s1575_s28  ;;  %s1021_s28 = scalar_lea.sflag [#allocation4], %s496_s29 }
  0xf7   : > { %p1510_p8 = pnand %p1509_p7, %p1505_p2 }
 0x148   : > { %v789_v51 = vpop.permute.xlu2 %788 }
 0x150   : > { %v1768_v62 = vpop.permute.xlu2 %888 }
 0x160   : > { %v667_v50 = vpop.permute.xlu0 %666 }
 0x161   : > { %1177 = vmatmul.msk.f32.vlgmr.msra.gmra.mxu2 %vm584_vm3, %v667_v50 }
 0x169   : > { %1182 = vmatmul.msk.f32.vlgmr.msrb.gmra.mxu2 %vm584_vm3, %v789_v51 }
 0x16c   : > { %v605_v53 = vpop.f32.mrf.mxu1 }
 0x16d   : > { %v606_v54 = vadd.f32 %v1303_v52, %v605_v53 }
 0x16f   : > { %v608_v55 = vadd.f32 %v606_v54, %v1756_v4 }
 0x171   : > { %v611_v56 = vsel %vm516_vm0, %v608_v55, 0.0 }
 0x172   : > { %612 = vadd.xlane.f32.xlu2 %v611_v56 }
 0x1e4   : > { %v687_v2 = vpop.f32.mrf.mxu2 }
 0x1e5   : > { %v688_v3 = vadd.f32 %v1304_v0, %v687_v2  ;;  %v613_v5 = vpop.xlane.xlu2 %612  ;;  %v656_v2 = vld [vmem:[#allocation10 + $0x8] sm:$0xff] }
 0x1e6   : > { %v621_v6 = vmul.f32 %v1773_v1, %v613_v5  ;;  %775 = vmatpush.msrb.mxu1 %v656_v2 }
 0x1e7   : > { %v690_v7 = vadd.f32 %v688_v3, %v1756_v4  ;;  %v655_v3 = vld [vmem:[#allocation10] sm:$0xff] }
 0x1e8   : > { %v1777_v8 = vsub.f32 %v608_v55, %v621_v6  ;;  %776 = vmatpush.msrb.mxu1 %v655_v3  ;;  %v1579_v6 = vmov 3  }
 0x1e9   : > { %v695_v9 = vsel %vm516_vm0, %v690_v7, 0.0 }
 0x1ea   : > { %696 = vadd.xlane.f32.xlu0 %v695_v9  ;;  %v623_v10 = vmul.f32 %v1777_v8, %v1777_v8 }
 0x1ec   : > { %v624_v11 = vsel %vm516_vm0, %v623_v10, 0.0  ;;  %v809_v20 = vpop.f32.mrf.mxu2 }
 0x1ed   : > { %625 = vadd.xlane.f32.xlu2 %v624_v11  ;;  %v810_v21 = vadd.f32 %v1305_v19, %v809_v20  ;;  %v1309_v19 = vld [vmem:[%s1899_s6] ss:$0 sm:$0xff] }
 0x1ef   : > { %v812_v22 = vadd.f32 %v810_v21, %v1756_v4 }
 0x1f1   : > { %v817_v23 = vsel %vm516_vm0, %v812_v22, 0.0 }
 0x25d   : > { %v697_v13 = vpop.xlane.xlu0 %696 }
 0x25e   : > { %v698_v14 = vmul.f32 %v697_v13, %v1773_v1 }
 0x260   : > { %v699_v15 = vsub.f32 %v690_v7, %v698_v14  ;;  %v626_v58 = vpop.xlane.xlu2 %625  ;;  %v1580_v7 = vmov 2  }
 0x261   : > { %v627_v59 = vmul.f32 %v626_v58, %v1773_v1  ;;  %1299 = vset.pattern.permute.xlu2 %v1580_v7 }
 0x262   : > { %v700_v16 = vmul.f32 %v699_v15, %v699_v15 }
 0x263   : > { %v628_v60 = vadd.f32 1e-05, %v627_v59  ;;  %v1313_v59 = vld [vmem:[%s1899_s6 + $0x3] ss:$0 sm:$0xff] }
 0x264   : > { %v701_v17 = vsel %vm516_vm0, %v700_v16, 0.0 }
 0x265   : > { %702 = vadd.xlane.f32.xlu1 %v701_v17  ;;  %vm635_vm9 = vweird.f32 %v628_v60 }
 0x27e   : > { %726 = vperm.xlu1 %1297, %v1790_v18  }
 0x286   : > { %1300 = vset.pattern.permute.xlu1 %v1579_v6 }
 0x2a8   : > { %818 = vadd.xlane.f32.xlu1 %v817_v23 }
 0x2c1   : > { %948 = vperm.xlu1 %1300, %v1790_v18  }
 0x2d8   : > { %v703_v29 = vpop.xlane.xlu1 %702 }
 0x2d9   : > { %v704_v30 = vmul.f32 %v703_v29, %v1773_v1  ;;  %v856_v29 = vld [vmem:[#allocation10 + $0x58] sm:$0xff] }
 0x2da   : > { %872 = vmatpush.msrb.mxu0 %v856_v29  ;;  %v1316_v29 = vld [vmem:[%s1903_s10] ss:$0 sm:$0xff] }
 0x2db   : > { %v705_v31 = vadd.f32 1e-05, %v704_v30 }
 0x2dd   : > { %1326 = vrsqrt.f32 %v705_v31  ;;  %vm712_vm6 = vweird.f32 %v705_v31 }
 0x2de   : > { %1328 = vrsqrt.f32 %v628_v60 }
 0x2e3   : > { %v1327_v32 = vpop.eup %1326 }
 0x2e4   : > { %v707_v33 = vmul.f32 %v1327_v32, %v705_v31  ;;  %vm713_vm5 = vweird.f32 %v1327_v32  ;;  %v855_v31 = vld [vmem:[#allocation10 + $0x50] sm:$0xff] }
 0x2e5   : > { %vm714_vm7 = vmor %vm712_vm6, %vm713_vm5  ;;  %873 = vmatpush.msrb.mxu0 %v855_v31  ;;  %v1317_v31 = vld [vmem:[%s1904_s11] ss:$0 sm:$0xff] }
 0x2e6   : > { %v708_v34 = vmul.f32 %v1327_v32, %v707_v33  ;;  %v853_v33 = vld [vmem:[#allocation10 + $0x40] sm:$0xff] }
 0x2e8   : > { %v709_v35 = vmul.f32 0.5, %v708_v34 }
 0x2ea   : > { %v710_v36 = vsub.f32 1.5, %v709_v35 }
 0x2ec   : > { %v711_v37 = vmul.f32 %v1327_v32, %v710_v36 }
 0x2ee   : > { %v715_v39 = vsel %vm714_vm7, %v1327_v32, %v711_v37  ;;  %v854_v32 = vld [vmem:[#allocation10 + $0x48] sm:$0xff]  ;;  %v956_v37 = vld [vmem:[#allocation10 + $0x78] sm:$0xff] }
 0x2ef   : > { %v716_v40 = vmul.f32 %v715_v39, %v699_v15  ;;  %874 = vmatpush.msrb.mxu0 %v854_v32  ;;  %972 = vmatpush.msra.mxu1 %v956_v37 }
 0x2f0   : > { %v727_v43 = vpop.permute.xlu1 %726 }
 0x2f1   : > { %v720_v42 = vmul.f32 %v1306_v38, %v716_v40  ;;  %875 = vmatpush.msrb.mxu0 %v853_v33  ;;  %v955_v38 = vld [vmem:[#allocation10 + $0x70] sm:$0xff] }
 0x2f2   : > { %973 = vmatpush.msra.mxu1 %v955_v38 }
 0x2f3   : > { %v724_v44 = vadd.f32 %v1307_v41, %v720_v42  ;;  %v953_v41 = vld [vmem:[#allocation10 + $0x60] sm:$0xff] }
 0x2f5   : > { %v729_v45 = vmul.f32 %v727_v43, %v724_v44  ;;  %v1311_v43 = vld [vmem:[%s1899_s6 + $0x2] ss:$0 sm:$0xff] }
 0x2f7   : > { %1179 = vmatmul.msk.f32.vlgmr.msra.gmra.mxu3 %vm516_vm0, %v729_v45 }
 0x2ff   : > { %1186 = vmatmul.msk.f32.vlgmr.msrb.gmra.mxu3 %vm584_vm3, %v1768_v62  ;;  %v1329_v62 = vpop.eup %1328 }
 0x300   : > { %v630_v0 = vmul.f32 %v1329_v62, %v628_v60  ;;  %vm636_vm8 = vweird.f32 %v1329_v62 }
 0x301   : > { %vm637_vm10 = vmor %vm635_vm9, %vm636_vm8 }
 0x302   : > { %v631_v5 = vmul.f32 %v1329_v62, %v630_v0 }
 0x304   : > { %v632_v11 = vmul.f32 0.5, %v631_v5 }
 0x306   : > { %v633_v14 = vsub.f32 1.5, %v632_v11 }
 0x308   : > { %v634_v16 = vmul.f32 %v1329_v62, %v633_v14 }
 0x30a   : > { %v638_v17 = vsel %vm637_vm10, %v1329_v62, %v634_v16 }
 0x30b   : > { %v639_v20 = vmul.f32 %v638_v17, %v1777_v8 }
 0x30d   : > { %v643_v23 = vmul.f32 %v1309_v19, %v639_v20 }
 0x31b   : > { %v819_v49 = vpop.xlane.xlu1 %818 }
 0x31c   : > { %v820_v51 = vmul.f32 %v819_v49, %v1773_v1  ;;  %v1312_v49 = vld [vmem:[#allocation8 + $0x2] ss:$0 sm:$0xff] }
 0x31e   : > { %v1812_v54 = vsub.f32 %v812_v22, %v820_v51  ;;  %v1310_v22 = vld [vmem:[#allocation8] ss:$0 sm:$0xff] }
 0x31f   : > { %v647_v24 = vadd.f32 %v1310_v22, %v643_v23 }
 0x320   : > { %v822_v56 = vmul.f32 %v1812_v54, %v1812_v54 }
 0x322   : > { %v823_v57 = vsel %vm516_vm0, %v822_v56, 0.0 }
 0x333   : > { %v949_v0 = vpop.permute.xlu1 %948 }
 0x37a   : > { %v1805_v47 = vpop.f32.mrf.mxu3 }
 0x382   : > { %v909_v50 = vpop.f32.mrf.mxu3 }
 0x383   : > { %v910_v52 = vadd.f32 %v1308_v48, %v909_v50 }
 0x385   : > { %v912_v53 = vadd.f32 %v910_v52, %v1756_v4 }
 0x387   : > { %v917_v55 = vsel %vm516_vm0, %v912_v53, 0.0 }
 0x388   : > { %918 = vadd.xlane.f32.xlu0 %v917_v55 }
 0x390   : > { %824 = vadd.xlane.f32.xlu0 %v823_v57 }
 0x3a4   : > { %651 = vperm.xlu0 %1298, %v1790_v18  }
 0x3ac   : > { %1301 = vset.pattern.permute.xlu0 %v1579_v6 }
 0x3fb   : > { %v919_v9 = vpop.xlane.xlu0 %918 }
 0x3fc   : > { %v920_v10 = vmul.f32 %v919_v9, %v1773_v1 }
 0x3fe   : > { %v1822_v12 = vsub.f32 %v912_v53, %v920_v10 }
 0x400   : > { %v922_v13 = vmul.f32 %v1822_v12, %v1822_v12 }
 0x402   : > { %v923_v15 = vsel %vm516_vm0, %v922_v13, 0.0  ;;  %v1315_v13 = vld [vmem:[%s1902_s9] ss:$0 sm:$0xff] }
 0x403   : > { %924 = vadd.xlane.f32.xlu2 %v923_v15  ;;  %v825_v21 = vpop.xlane.xlu0 %824 }
 0x404   : > { %v826_v27 = vmul.f32 %v825_v21, %v1773_v1 }
 0x406   : > { %v827_v28 = vadd.f32 1e-05, %v826_v27 }
 0x408   : > { %1330 = vrsqrt.f32 %v827_v28  ;;  %vm834_vm12 = vweird.f32 %v827_v28 }
 0x40e   : > { %v1331_v30 = vpop.eup %1330 }
 0x40f   : > { %v829_v8 = vmul.f32 %v1331_v30, %v827_v28  ;;  %vm835_vm11 = vweird.f32 %v1331_v30 }
 0x410   : > { %vm836_vm13 = vmor %vm834_vm12, %vm835_vm11 }
 0x411   : > { %v830_v34 = vmul.f32 %v1331_v30, %v829_v8 }
 0x413   : > { %v831_v35 = vmul.f32 0.5, %v830_v34 }
 0x415   : > { %v832_v36 = vsub.f32 1.5, %v831_v35 }
 0x416   : > { %v652_v25 = vpop.permute.xlu0 %651 }
 0x417   : > { %v654_v26 = vmul.f32 %v652_v25, %v647_v24  ;;  %v833_v39 = vmul.f32 %v1331_v30, %v832_v36 }
 0x419   : > { %1180 = vmatmul.msk.f32.vlgmr.msrb.gmra.mxu1 %vm516_vm0, %v654_v26  ;;  %v837_v40 = vsel %vm836_vm13, %v1331_v30, %v833_v39 }
 0x41a   : > { %v838_v42 = vmul.f32 %v837_v40, %v1812_v54 }
 0x41b   : > { %848 = vperm.xlu2 %1299, %v1790_v18   ;;  %v954_v18 = vld [vmem:[#allocation10 + $0x68] sm:$0xff] }
 0x41c   : > { %974 = vmatpush.msra.mxu1 %v954_v18  ;;  %v842_v48 = vmul.f32 %v1311_v43, %v838_v42 }
 0x41e   : > { %975 = vmatpush.msra.mxu1 %v953_v41  ;;  %v846_v50 = vadd.f32 %v1312_v49, %v842_v48 }
 0x476   : > { %v925_v44 = vpop.xlane.xlu2 %924 }
 0x477   : > { %v926_v45 = vmul.f32 %v925_v44, %v1773_v1 }
 0x479   : > { %v927_v46 = vadd.f32 1e-05, %v926_v45 }
 0x47b   : > { %1332 = vrsqrt.f32 %v927_v46  ;;  %vm934_vm15 = vweird.f32 %v927_v46 }
 0x47e   : > { %v849_v51 = vpop.permute.xlu2 %848 }
 0x47f   : > { %v851_v52 = vmul.f32 %v849_v51, %v846_v50 }
 0x481   : > { %v1333_v53 = vpop.eup %1332  ;;  %1184 = vmatmul.msk.f32.vlgmr.msrb.gmra.mxu0 %vm516_vm0, %v851_v52 }
 0x482   : > { %v929_v55 = vmul.f32 %v1333_v53, %v927_v46  ;;  %vm935_vm14 = vweird.f32 %v1333_v53 }
 0x483   : > { %vm936_vm1 = vmor %vm934_vm15, %vm935_vm14 }
 0x484   : > { %v930_v56 = vmul.f32 %v1333_v53, %v929_v55 }
 0x486   : > { %v931_v54 = vmul.f32 0.5, %v930_v56 }
 0x488   : > { %v932_v57 = vsub.f32 1.5, %v931_v54 }
 0x48a   : > { %v933_v58 = vmul.f32 %v1333_v53, %v932_v57 }
 0x48c   : > { %v937_v60 = vsel %vm936_vm1, %v1333_v53, %v933_v58 }
 0x48d   : > { %v938_v62 = vmul.f32 %v937_v60, %v1822_v12 }
 0x48f   : > { %v942_v63 = vmul.f32 %v1313_v59, %v938_v62 }
 0x491   : > { %v946_v2 = vadd.f32 %v1314_v61, %v942_v63 }
 0x493   : > { %v951_v3 = vmul.f32 %v949_v0, %v946_v2 }
 0x495   : > { %1188 = vmatmul.msk.f32.vlgmr.msra.gmra.mxu1 %vm516_vm0, %v951_v3 }
 0x496   : > { %v778_v5 = vpop.f32.mrf.mxu1 }
 0x497   : > { %v779_v7 = vadd.f32 %v778_v5, %v1805_v47 }
 0x4fe   : > { %v877_v6 = vpop.f32.mrf.mxu0 }
 0x4ff   : > { %v880_v9 = vadd.f32 %v877_v6, %v779_v7 }
 0x512   : > { %v977_v10 = vpop.f32.mrf.mxu1 }
 0x513   : > { %v980_v11 = vadd.f32 %v977_v10, %v880_v9 }
 0x515   : > { %v981_v14 = vadd.f32 %v980_v11, %v1756_v4 }
 0x517   : > { %v986_v12 = vadd.f32 %v1315_v13, %v981_v14 }
 0x519   : > { %v989_v15 = vsel %vm516_vm0, %v986_v12, 0.0 }
 0x51a   : > { %990 = vadd.xlane.f32.xlu2 %v989_v15 }
 0x58d   : > { %v991_v16 = vpop.xlane.xlu2 %990 }
 0x58e   : > { %v992_v17 = vmul.f32 %v991_v16, %v1773_v1 }
 0x590   : > { %v993_v19 = vsub.f32 %v986_v12, %v992_v17 }
 0x592   : > { %v994_v47 = vmul.f32 %v993_v19, %v993_v19 }
 0x594   : > { %v995_v20 = vsel %vm516_vm0, %v994_v47, 0.0 }
 0x595   : > { %996 = vadd.xlane.f32.xlu1 %v995_v20 }
 0x608   : > { %v997_v21 = vpop.xlane.xlu1 %996 }
 0x609   : > { %v998_v22 = vmul.f32 %v997_v21, %v1773_v1 }
 0x60b   : > { %v999_v23 = vadd.f32 1e-05, %v998_v22 }
 0x60d   : > { %1334 = vrsqrt.f32 %v999_v23  ;;  %vm1006_vm3 = vweird.f32 %v999_v23 }
 0x613   : > { %v1335_v4 = vpop.eup %1334 }
 0x614   : > { %v1001_v24 = vmul.f32 %v1335_v4, %v999_v23  ;;  %vm1007_vm2 = vweird.f32 %v1335_v4 }
 0x615   : > { %vm1008_vm4 = vmor %vm1006_vm3, %vm1007_vm2 }
 0x616   : > { %v1002_v25 = vmul.f32 %v1335_v4, %v1001_v24 }
 0x618   : > { %v1003_v26 = vmul.f32 0.5, %v1002_v25 }
 0x61a   : > { %v1004_v27 = vsub.f32 1.5, %v1003_v26 }
 0x61c   : > { %v1005_v28 = vmul.f32 %v1335_v4, %v1004_v27 }
 0x61e   : > { %v1009_v1 = vsel %vm1008_vm4, %v1335_v4, %v1005_v28 }
 0x61f   : > { %v1010_v30 = vmul.f32 %v1009_v1, %v993_v19 }
 0x621   : > { %v1014_v8 = vmul.f32 %v1316_v29, %v1010_v30 }
 0x623   : > { %v1018_v32 = vadd.f32 %v1317_v31, %v1014_v8 }
 0x625   : > { %1019 = vst.msk [vmem:[%s498_s14] sm:$0xff] %vm516_vm0, %v1018_v32 }
 0x626   : > { %1513 = shalt.err (!%p1510_p8)
}
 0x627   : > { %1213 = dma.vmem_to_hbm [thread:$0]  (%p1684_p5), %s1034_s25, 128, %s1036_s15, %s1021_s28  }
 0x628 PF: > { %s1926_s29 = sld [smem:[#allocation18_spill]] }
 0x629   : > { %s1927_s26 = sld [smem:[#allocation16_spill]] }
 0x62e   : > { %p1245_p9 = scmp.ge.s32.totalorder %s1926_s29, 2 }
 0x62f   : > { %s1047_s21 = sand.u32 1, %s1927_s26  }
 0x630   : > { %p1232_p10 = pnand %p1245_p9, %p1688_p6  ;;  %s1048_s24 = scalar_lea.sflag [#allocation4], %s1047_s21 }
 0x632   : > { %p1233_p11 = pneg %p1232_p10 }
 0x634   : > { %1543 = dma.done.wait (%p1233_p11), %s1048_s24, 128  }
 0x635   : > { %1545 = vsyncadd (%p1233_p11), %s1048_s24, 4294967168  ;;  %s1929_s24 = sld [smem:[#allocation19_spill]]  ;;  %s1932_s21 = smov %s1552_s22 }
 0x636   : > { %s1930_s27 = sld [smem:[#allocation17_spill]] }
 0x637   : > { %s1931_s23 = sld [smem:[#allocation20_spill]] }
 0x63b   : > { %p25_p12 = scmp.ge.s32.totalorder %s1929_s24, 4  }
 0x63c   : > { %s1933_s22 = smov %s1930_s27 }
 0x63d   :  { %27 = sbr.rel (!%p25_p12) target bundleno = 9 (0x9), region = 142 }
 0x642   :  { %1054 = vsyncpa [#allocation3], 1 }
 0x643   :  { %1056 = vsyncpa [#allocation3 + $0x1], 1 }
 0x644   :  { %1057 = vsyncpa [#allocation6], 1 }
 0x645   :  { %1058 = vsyncpa [#allocation9], 1 }
 0x646   :  { %1059 = vsyncpa [#allocation4], 1 }
 0x647   :  { %1061 = vsyncpa [#allocation4 + $0x1], 1 }

</bundles_post_ra>
